<compile_context>
chip_gen: v5e
topology: v5e:2x2
jax: 0.10.0
libtpu: 0.0.40
codegen_flags: <defaults>
</compile_context>

<pallas_src>
import jax
import jax.numpy as jnp
from jax.experimental import pallas as pl
from jax.experimental.pallas import tpu as pltpu


def bilstm_head_kernel(text_ref, g_ref, whh_f_ref, w_head_ref, b_all_ref, out_ref):
    TN = text_ref.shape[0]                  # T*N token ids, time-major
    N = out_ref.shape[0]
    T = TN // N
    H = whh_f_ref.shape[0]                  # Whh_f stored K-major: (H, 4H)
    V = g_ref.shape[0]                      # padded vocab (lane-dense contraction)

    # ---------------- fused embedding gather + input projection (one MXU call)
    # one-hot(text) @ G  ==  emb_table[text] @ [Wih_f | Wih_b]^T, with the gather
    # folded into the matmul.  Lanes [0:4H] = forward gates, [4H:8H] = reverse.
    idx = text_ref[...]                                            # (T*N, 1) int32
    col = jax.lax.broadcasted_iota(jnp.int32, (TN, V), 1)
    onehot = jnp.where(col == idx, 1.0, 0.0).astype(jnp.bfloat16)  # (T*N, V) bf16
    xg_all = jnp.dot(onehot, g_ref[...],
                     preferred_element_type=jnp.float32)           # (T*N, 8H) f32
    xg_all = xg_all + b_all_ref[:, :8 * H]                         # biases folded once

    xg_f = xg_all[:, :4 * H]               # forward-cell gate pre-acts, all steps
    gates_b = xg_all[(T - 1) * N:, 4 * H:] # reverse cell's first step = x[T-1]
                                           # (zero init state => Whh_b term == 0)

    whh_f = whh_f_ref[...]                 # (H, 4H) bf16, K-major

    def gate_combine(gates, c_prev):
        # One sigmoid + one tanh over the whole (N, 4H) slab, then slice.
        # Torch gate order: i, f, g, o.  All elementwise math in f32 (v5e-safe).
        sg = jax.nn.sigmoid(gates)
        th = jnp.tanh(gates)
        i = sg[:, 0 * H:1 * H]
        f = sg[:, 1 * H:2 * H]
        g = th[:, 2 * H:3 * H]
        o = sg[:, 3 * H:4 * H]
        c_new = f * c_prev + i * g
        h_new = o * jnp.tanh(c_new)
        return h_new, c_new

    # ------------------------------------------------------ forward recurrence
    # Fully unrolled (T static & small); per step only the (N,H)x(H,4H) hidden
    # matmul + elementwise gate math remain on the chain.
    h = jnp.zeros((N, H), jnp.bfloat16)    # h only ever feeds matmuls -> bf16
    c = jnp.zeros((N, H), jnp.float32)
    for t in range(T):
        gates = xg_f[t * N:(t + 1) * N, :] + jnp.dot(
            h, whh_f, preferred_element_type=jnp.float32)
        h_f32, c = gate_combine(gates, c)
        h = h_f32.astype(jnp.bfloat16)

    # ------------------------------------------------------------ reverse step
    h_b, _ = gate_combine(gates_b, jnp.zeros((N, H), jnp.float32))

    # ---------------------------------------------------- fused fc1·fc2 head
    # z = h_fwd @ W_head[:H] + h_bwd @ W_head[H:] + b_head ; out = sigmoid(z)
    w_head = w_head_ref[...]                                       # (2H, OUT_PAD)
    z = (jnp.dot(h, w_head[:H, :], preferred_element_type=jnp.float32)
         + jnp.dot(h_b.astype(jnp.bfloat16), w_head[H:, :],
                   preferred_element_type=jnp.float32)
         + b_all_ref[:, 8 * H:])                                   # (N, OUT_PAD)
    out_ref[...] = jax.nn.sigmoid(z)


def init_params(key, input_dim, embedding_dim, hidden_dim, output_dim):
    """Torch-layout f32 parameters (what nn.Module would hold)."""
    keys = jax.random.split(key, 12)
    H, E = hidden_dim, embedding_dim
    s = 0.1
    return {
        "embedding": jax.random.normal(keys[0], (input_dim, E), jnp.float32) * s,
        # forward direction (torch layout: (4H, E) / (4H, H))
        "wih_f": jax.random.normal(keys[1], (4 * H, E), jnp.float32) * s,
        "whh_f": jax.random.normal(keys[2], (4 * H, H), jnp.float32) * s,
        # combined bias b_ih + b_hh per direction, kept 2D for lane broadcasting
        "b_f": jax.random.normal(keys[3], (1, 4 * H), jnp.float32) * s,
        # reverse direction (whh_b cannot influence output[-1] with zero init state)
        "wih_b": jax.random.normal(keys[4], (4 * H, E), jnp.float32) * s,
        "whh_b": jax.random.normal(keys[5], (4 * H, H), jnp.float32) * s,
        "b_b": jax.random.normal(keys[6], (1, 4 * H), jnp.float32) * s,
        # fc1: Linear(2H -> 128), fc2: Linear(128 -> output_dim)
        "fc1_w": jax.random.normal(keys[7], (128, 2 * H), jnp.float32) * s,
        "fc1_b": jax.random.normal(keys[8], (1, 128), jnp.float32) * s,
        "fc2_w": jax.random.normal(keys[9], (output_dim, 128), jnp.float32) * s,
        "fc2_b": jax.random.normal(keys[10], (1, output_dim), jnp.float32) * s,
    }


def prepare_inference_params(params):
    """One-time weight preprocessing, hoisted out of the per-call path."""
    vocab, E = params["embedding"].shape
    H = params["whh_f"].shape[1]
    out_dim = params["fc2_w"].shape[0]
    out_pad = ((out_dim + 127) // 128) * 128
    vocab_pad = ((vocab + 127) // 128) * 128   # lane-dense one-hot contraction

    # Fused gather + input projection table: G[v] = emb[v] @ [Wih_f | Wih_b]^T.
    wih_cat_t = jnp.concatenate([params["wih_f"].T, params["wih_b"].T], axis=1)  # (E, 8H)
    g = params["embedding"] @ wih_cat_t                                           # (V, 8H) f32
    g = jnp.pad(g, ((0, vocab_pad - vocab), (0, 0))).astype(jnp.bfloat16)

    whh_f_t = params["whh_f"].T.astype(jnp.bfloat16)                              # (H, 4H)

    # Fused fc1·fc2 head (no nonlinearity/dropout between them in forward()).
    w_head = (params["fc2_w"] @ params["fc1_w"]).T                                # (2H, out)
    w_head = jnp.pad(w_head, ((0, 0), (0, out_pad - out_dim))).astype(jnp.bfloat16)
    b_head = params["fc1_b"] @ params["fc2_w"].T + params["fc2_b"]                # (1, out)
    b_head = jnp.pad(b_head, ((0, 0), (0, out_pad - out_dim)))

    # Single packed f32 bias row: [b_f | b_b | b_head_padded].
    b_all = jnp.concatenate([params["b_f"], params["b_b"], b_head], axis=1)

    prep = {"G": g, "whh_f": whh_f_t, "w_head": w_head, "b_all": b_all,
            "H": H, "out_dim": out_dim, "out_pad": out_pad}
    return jax.tree_util.tree_map(
        lambda x: jax.device_put(x) if isinstance(x, jnp.ndarray) else x, prep)


def model_forward(text, prep):
    """Steady-state forward: just one pallas_call (plus a reshape / final slice)."""
    T, N = text.shape
    out_pad = prep["out_pad"]
    text_flat = text.reshape(T * N, 1).astype(jnp.int32)   # time-major rows

    vmem = pl.BlockSpec(memory_space=pltpu.MemorySpace.VMEM)
    out_full = pl.pallas_call(
        bilstm_head_kernel,
        out_shape=jax.ShapeDtypeStruct((N, out_pad), jnp.float32),
        in_specs=[vmem] * 5,
        out_specs=vmem,
    )(text_flat, prep["G"], prep["whh_f"], prep["w_head"], prep["b_all"])
    return out_full[:, :prep["out_dim"]]


if __name__ == "__main__":
    # Small shapes consistent with Model.forward: text is (max_len, N) int ids.
    VOCAB = 50        # input_dim
    EMB = 32          # embedding_dim
    HID = 32          # hidden_dim
    OUT = 4           # output_dim
    T = 8             # sequence length
    N = 8             # batch

    key = jax.random.PRNGKey(0)
    pkey, tkey = jax.random.split(key)
    params = init_params(pkey, VOCAB, EMB, HID, OUT)
    prep = prepare_inference_params(params)          # one-time, cached
    text = jax.random.randint(tkey, (T, N), 0, VOCAB, dtype=jnp.int32)

    y = model_forward(text, prep)
    y = jax.block_until_ready(y)
    assert y.shape == (N, OUT) and y.dtype == jnp.float32
    print("KERNEL_OK")
</pallas_src>

<mosaic_0001>
module attributes {stable_mosaic.version = 11 : i64} {
  func.func @bilstm_head_kernel(%arg0: memref<64x1xi32, #tpu.memory_space<vmem>>, %arg1: memref<128x256xbf16, #tpu.memory_space<vmem>>, %arg2: memref<32x128xbf16, #tpu.memory_space<vmem>>, %arg3: memref<64x128xbf16, #tpu.memory_space<vmem>>, %arg4: memref<1x384xf32, #tpu.memory_space<vmem>>, %arg5: memref<8x128xf32, #tpu.memory_space<vmem>>) attributes {dimension_semantics = [], scalar_prefetch = 0 : i64, scratch_operands = 0 : i64, tpu.core_type = #tpu.core_type<tc>} {
    %c0 = arith.constant 0 : index
    %c0_0 = arith.constant 0 : index
    %0 = vector.load %arg0[%c0, %c0_0] : memref<64x1xi32, #tpu.memory_space<vmem>>, vector<64x1xi32>
    %1 = tpu.iota {dimensions = array<i32: 1>} : vector<64x128xi32>
    %2 = vector.broadcast %0 : vector<64x1xi32> to vector<64x128xi32>
    %3 = arith.cmpi eq, %1, %2 : vector<64x128xi32>
    %cst = arith.constant 1.000000e+00 : f32
    %cst_1 = arith.constant 0.000000e+00 : f32
    %4 = vector.broadcast %cst : f32 to vector<64x128xf32>
    %5 = vector.broadcast %cst_1 : f32 to vector<64x128xf32>
    %6 = arith.select %3, %4, %5 : vector<64x128xi1>, vector<64x128xf32>
    %7 = arith.truncf %6 : vector<64x128xf32> to vector<64x128xbf16>
    %c0_2 = arith.constant 0 : index
    %c0_3 = arith.constant 0 : index
    %8 = vector.load %arg1[%c0_2, %c0_3] : memref<128x256xbf16, #tpu.memory_space<vmem>>, vector<128x256xbf16>
    %cst_4 = arith.constant dense<0.000000e+00> : vector<64x256xf32>
    %9 = tpu.matmul %7, %8, %cst_4 {dimension_numbers = #tpu.dot_dimension_numbers<[1], [0], [0], [1], [0, 0, 1, 1], [], []>} : vector<64x128xbf16>, vector<128x256xbf16>, vector<64x256xf32> -> vector<64x256xf32>
    %c0_5 = arith.constant 0 : index
    %c0_6 = arith.constant 0 : index
    %10 = vector.load %arg4[%c0_5, %c0_6] : memref<1x384xf32, #tpu.memory_space<vmem>>, vector<1x256xf32>
    %11 = vector.broadcast %10 : vector<1x256xf32> to vector<64x256xf32>
    %12 = arith.addf %9, %11 : vector<64x256xf32>
    %13 = vector.extract_strided_slice %12 {offsets = [0, 0], sizes = [64, 128], strides = [1, 1]} : vector<64x256xf32> to vector<64x128xf32>
    %14 = vector.extract_strided_slice %12 {offsets = [56, 128], sizes = [8, 128], strides = [1, 1]} : vector<64x256xf32> to vector<8x128xf32>
    %c0_7 = arith.constant 0 : index
    %c0_8 = arith.constant 0 : index
    %15 = vector.load %arg2[%c0_7, %c0_8] : memref<32x128xbf16, #tpu.memory_space<vmem>>, vector<32x128xbf16>
    %cst_9 = arith.constant 0.000000e+00 : bf16
    %16 = vector.broadcast %cst_9 : bf16 to vector<8x32xbf16>
    %cst_10 = arith.constant 0.000000e+00 : f32
    %17 = vector.broadcast %cst_10 : f32 to vector<8x32xf32>
    %18 = vector.extract_strided_slice %13 {offsets = [0, 0], sizes = [8, 128], strides = [1, 1]} : vector<64x128xf32> to vector<8x128xf32>
    %cst_11 = arith.constant dense<0.000000e+00> : vector<8x128xf32>
    %19 = tpu.matmul %16, %15, %cst_11 {dimension_numbers = #tpu.dot_dimension_numbers<[1], [0], [0], [1], [0, 0, 1, 1], [], []>} : vector<8x32xbf16>, vector<32x128xbf16>, vector<8x128xf32> -> vector<8x128xf32>
    %20 = arith.addf %18, %19 : vector<8x128xf32>
    %21 = arith.negf %20 : vector<8x128xf32>
    %22 = math.exp %21 : vector<8x128xf32>
    %cst_12 = arith.constant 1.000000e+00 : f32
    %23 = vector.broadcast %cst_12 : f32 to vector<8x128xf32>
    %24 = arith.addf %23, %22 : vector<8x128xf32>
    %25 = arith.divf %23, %24 : vector<8x128xf32>
    %26 = math.tanh %20 : vector<8x128xf32>
    %27 = vector.extract_strided_slice %25 {offsets = [0, 0], sizes = [8, 32], strides = [1, 1]} : vector<8x128xf32> to vector<8x32xf32>
    %28 = vector.extract_strided_slice %25 {offsets = [0, 32], sizes = [8, 32], strides = [1, 1]} : vector<8x128xf32> to vector<8x32xf32>
    %29 = vector.extract_strided_slice %26 {offsets = [0, 64], sizes = [8, 32], strides = [1, 1]} : vector<8x128xf32> to vector<8x32xf32>
    %30 = vector.extract_strided_slice %25 {offsets = [0, 96], sizes = [8, 32], strides = [1, 1]} : vector<8x128xf32> to vector<8x32xf32>
    %31 = arith.mulf %28, %17 : vector<8x32xf32>
    %32 = arith.mulf %27, %29 : vector<8x32xf32>
    %33 = arith.addf %31, %32 : vector<8x32xf32>
    %34 = math.tanh %33 : vector<8x32xf32>
    %35 = arith.mulf %30, %34 : vector<8x32xf32>
    %36 = arith.truncf %35 : vector<8x32xf32> to vector<8x32xbf16>
    %37 = vector.extract_strided_slice %13 {offsets = [8, 0], sizes = [8, 128], strides = [1, 1]} : vector<64x128xf32> to vector<8x128xf32>
    %cst_13 = arith.constant dense<0.000000e+00> : vector<8x128xf32>
    %38 = tpu.matmul %36, %15, %cst_13 {dimension_numbers = #tpu.dot_dimension_numbers<[1], [0], [0], [1], [0, 0, 1, 1], [], []>} : vector<8x32xbf16>, vector<32x128xbf16>, vector<8x128xf32> -> vector<8x128xf32>
    %39 = arith.addf %37, %38 : vector<8x128xf32>
    %40 = arith.negf %39 : vector<8x128xf32>
    %41 = math.exp %40 : vector<8x128xf32>
    %cst_14 = arith.constant 1.000000e+00 : f32
    %42 = vector.broadcast %cst_14 : f32 to vector<8x128xf32>
    %43 = arith.addf %42, %41 : vector<8x128xf32>
    %44 = arith.divf %42, %43 : vector<8x128xf32>
    %45 = math.tanh %39 : vector<8x128xf32>
    %46 = vector.extract_strided_slice %44 {offsets = [0, 0], sizes = [8, 32], strides = [1, 1]} : vector<8x128xf32> to vector<8x32xf32>
    %47 = vector.extract_strided_slice %44 {offsets = [0, 32], sizes = [8, 32], strides = [1, 1]} : vector<8x128xf32> to vector<8x32xf32>
    %48 = vector.extract_strided_slice %45 {offsets = [0, 64], sizes = [8, 32], strides = [1, 1]} : vector<8x128xf32> to vector<8x32xf32>
    %49 = vector.extract_strided_slice %44 {offsets = [0, 96], sizes = [8, 32], strides = [1, 1]} : vector<8x128xf32> to vector<8x32xf32>
    %50 = arith.mulf %47, %33 : vector<8x32xf32>
    %51 = arith.mulf %46, %48 : vector<8x32xf32>
    %52 = arith.addf %50, %51 : vector<8x32xf32>
    %53 = math.tanh %52 : vector<8x32xf32>
    %54 = arith.mulf %49, %53 : vector<8x32xf32>
    %55 = arith.truncf %54 : vector<8x32xf32> to vector<8x32xbf16>
    %56 = vector.extract_strided_slice %13 {offsets = [16, 0], sizes = [8, 128], strides = [1, 1]} : vector<64x128xf32> to vector<8x128xf32>
    %cst_15 = arith.constant dense<0.000000e+00> : vector<8x128xf32>
    %57 = tpu.matmul %55, %15, %cst_15 {dimension_numbers = #tpu.dot_dimension_numbers<[1], [0], [0], [1], [0, 0, 1, 1], [], []>} : vector<8x32xbf16>, vector<32x128xbf16>, vector<8x128xf32> -> vector<8x128xf32>
    %58 = arith.addf %56, %57 : vector<8x128xf32>
    %59 = arith.negf %58 : vector<8x128xf32>
    %60 = math.exp %59 : vector<8x128xf32>
    %cst_16 = arith.constant 1.000000e+00 : f32
    %61 = vector.broadcast %cst_16 : f32 to vector<8x128xf32>
    %62 = arith.addf %61, %60 : vector<8x128xf32>
    %63 = arith.divf %61, %62 : vector<8x128xf32>
    %64 = math.tanh %58 : vector<8x128xf32>
    %65 = vector.extract_strided_slice %63 {offsets = [0, 0], sizes = [8, 32], strides = [1, 1]} : vector<8x128xf32> to vector<8x32xf32>
    %66 = vector.extract_strided_slice %63 {offsets = [0, 32], sizes = [8, 32], strides = [1, 1]} : vector<8x128xf32> to vector<8x32xf32>
    %67 = vector.extract_strided_slice %64 {offsets = [0, 64], sizes = [8, 32], strides = [1, 1]} : vector<8x128xf32> to vector<8x32xf32>
    %68 = vector.extract_strided_slice %63 {offsets = [0, 96], sizes = [8, 32], strides = [1, 1]} : vector<8x128xf32> to vector<8x32xf32>
    %69 = arith.mulf %66, %52 : vector<8x32xf32>
    %70 = arith.mulf %65, %67 : vector<8x32xf32>
    %71 = arith.addf %69, %70 : vector<8x32xf32>
    %72 = math.tanh %71 : vector<8x32xf32>
    %73 = arith.mulf %68, %72 : vector<8x32xf32>
    %74 = arith.truncf %73 : vector<8x32xf32> to vector<8x32xbf16>
    %75 = vector.extract_strided_slice %13 {offsets = [24, 0], sizes = [8, 128], strides = [1, 1]} : vector<64x128xf32> to vector<8x128xf32>
    %cst_17 = arith.constant dense<0.000000e+00> : vector<8x128xf32>
    %76 = tpu.matmul %74, %15, %cst_17 {dimension_numbers = #tpu.dot_dimension_numbers<[1], [0], [0], [1], [0, 0, 1, 1], [], []>} : vector<8x32xbf16>, vector<32x128xbf16>, vector<8x128xf32> -> vector<8x128xf32>
    %77 = arith.addf %75, %76 : vector<8x128xf32>
    %78 = arith.negf %77 : vector<8x128xf32>
    %79 = math.exp %78 : vector<8x128xf32>
    %cst_18 = arith.constant 1.000000e+00 : f32
    %80 = vector.broadcast %cst_18 : f32 to vector<8x128xf32>
    %81 = arith.addf %80, %79 : vector<8x128xf32>
    %82 = arith.divf %80, %81 : vector<8x128xf32>
    %83 = math.tanh %77 : vector<8x128xf32>
    %84 = vector.extract_strided_slice %82 {offsets = [0, 0], sizes = [8, 32], strides = [1, 1]} : vector<8x128xf32> to vector<8x32xf32>
    %85 = vector.extract_strided_slice %82 {offsets = [0, 32], sizes = [8, 32], strides = [1, 1]} : vector<8x128xf32> to vector<8x32xf32>
    %86 = vector.extract_strided_slice %83 {offsets = [0, 64], sizes = [8, 32], strides = [1, 1]} : vector<8x128xf32> to vector<8x32xf32>
    %87 = vector.extract_strided_slice %82 {offsets = [0, 96], sizes = [8, 32], strides = [1, 1]} : vector<8x128xf32> to vector<8x32xf32>
    %88 = arith.mulf %85, %71 : vector<8x32xf32>
    %89 = arith.mulf %84, %86 : vector<8x32xf32>
    %90 = arith.addf %88, %89 : vector<8x32xf32>
    %91 = math.tanh %90 : vector<8x32xf32>
    %92 = arith.mulf %87, %91 : vector<8x32xf32>
    %93 = arith.truncf %92 : vector<8x32xf32> to vector<8x32xbf16>
    %94 = vector.extract_strided_slice %13 {offsets = [32, 0], sizes = [8, 128], strides = [1, 1]} : vector<64x128xf32> to vector<8x128xf32>
    %cst_19 = arith.constant dense<0.000000e+00> : vector<8x128xf32>
    %95 = tpu.matmul %93, %15, %cst_19 {dimension_numbers = #tpu.dot_dimension_numbers<[1], [0], [0], [1], [0, 0, 1, 1], [], []>} : vector<8x32xbf16>, vector<32x128xbf16>, vector<8x128xf32> -> vector<8x128xf32>
    %96 = arith.addf %94, %95 : vector<8x128xf32>
    %97 = arith.negf %96 : vector<8x128xf32>
    %98 = math.exp %97 : vector<8x128xf32>
    %cst_20 = arith.constant 1.000000e+00 : f32
    %99 = vector.broadcast %cst_20 : f32 to vector<8x128xf32>
    %100 = arith.addf %99, %98 : vector<8x128xf32>
    %101 = arith.divf %99, %100 : vector<8x128xf32>
    %102 = math.tanh %96 : vector<8x128xf32>
    %103 = vector.extract_strided_slice %101 {offsets = [0, 0], sizes = [8, 32], strides = [1, 1]} : vector<8x128xf32> to vector<8x32xf32>
    %104 = vector.extract_strided_slice %101 {offsets = [0, 32], sizes = [8, 32], strides = [1, 1]} : vector<8x128xf32> to vector<8x32xf32>
    %105 = vector.extract_strided_slice %102 {offsets = [0, 64], sizes = [8, 32], strides = [1, 1]} : vector<8x128xf32> to vector<8x32xf32>
    %106 = vector.extract_strided_slice %101 {offsets = [0, 96], sizes = [8, 32], strides = [1, 1]} : vector<8x128xf32> to vector<8x32xf32>
    %107 = arith.mulf %104, %90 : vector<8x32xf32>
    %108 = arith.mulf %103, %105 : vector<8x32xf32>
    %109 = arith.addf %107, %108 : vector<8x32xf32>
    %110 = math.tanh %109 : vector<8x32xf32>
    %111 = arith.mulf %106, %110 : vector<8x32xf32>
    %112 = arith.truncf %111 : vector<8x32xf32> to vector<8x32xbf16>
    %113 = vector.extract_strided_slice %13 {offsets = [40, 0], sizes = [8, 128], strides = [1, 1]} : vector<64x128xf32> to vector<8x128xf32>
    %cst_21 = arith.constant dense<0.000000e+00> : vector<8x128xf32>
    %114 = tpu.matmul %112, %15, %cst_21 {dimension_numbers = #tpu.dot_dimension_numbers<[1], [0], [0], [1], [0, 0, 1, 1], [], []>} : vector<8x32xbf16>, vector<32x128xbf16>, vector<8x128xf32> -> vector<8x128xf32>
    %115 = arith.addf %113, %114 : vector<8x128xf32>
    %116 = arith.negf %115 : vector<8x128xf32>
    %117 = math.exp %116 : vector<8x128xf32>
    %cst_22 = arith.constant 1.000000e+00 : f32
    %118 = vector.broadcast %cst_22 : f32 to vector<8x128xf32>
    %119 = arith.addf %118, %117 : vector<8x128xf32>
    %120 = arith.divf %118, %119 : vector<8x128xf32>
    %121 = math.tanh %115 : vector<8x128xf32>
    %122 = vector.extract_strided_slice %120 {offsets = [0, 0], sizes = [8, 32], strides = [1, 1]} : vector<8x128xf32> to vector<8x32xf32>
    %123 = vector.extract_strided_slice %120 {offsets = [0, 32], sizes = [8, 32], strides = [1, 1]} : vector<8x128xf32> to vector<8x32xf32>
    %124 = vector.extract_strided_slice %121 {offsets = [0, 64], sizes = [8, 32], strides = [1, 1]} : vector<8x128xf32> to vector<8x32xf32>
    %125 = vector.extract_strided_slice %120 {offsets = [0, 96], sizes = [8, 32], strides = [1, 1]} : vector<8x128xf32> to vector<8x32xf32>
    %126 = arith.mulf %123, %109 : vector<8x32xf32>
    %127 = arith.mulf %122, %124 : vector<8x32xf32>
    %128 = arith.addf %126, %127 : vector<8x32xf32>
    %129 = math.tanh %128 : vector<8x32xf32>
    %130 = arith.mulf %125, %129 : vector<8x32xf32>
    %131 = arith.truncf %130 : vector<8x32xf32> to vector<8x32xbf16>
    %132 = vector.extract_strided_slice %13 {offsets = [48, 0], sizes = [8, 128], strides = [1, 1]} : vector<64x128xf32> to vector<8x128xf32>
    %cst_23 = arith.constant dense<0.000000e+00> : vector<8x128xf32>
    %133 = tpu.matmul %131, %15, %cst_23 {dimension_numbers = #tpu.dot_dimension_numbers<[1], [0], [0], [1], [0, 0, 1, 1], [], []>} : vector<8x32xbf16>, vector<32x128xbf16>, vector<8x128xf32> -> vector<8x128xf32>
    %134 = arith.addf %132, %133 : vector<8x128xf32>
    %135 = arith.negf %134 : vector<8x128xf32>
    %136 = math.exp %135 : vector<8x128xf32>
    %cst_24 = arith.constant 1.000000e+00 : f32
    %137 = vector.broadcast %cst_24 : f32 to vector<8x128xf32>
    %138 = arith.addf %137, %136 : vector<8x128xf32>
    %139 = arith.divf %137, %138 : vector<8x128xf32>
    %140 = math.tanh %134 : vector<8x128xf32>
    %141 = vector.extract_strided_slice %139 {offsets = [0, 0], sizes = [8, 32], strides = [1, 1]} : vector<8x128xf32> to vector<8x32xf32>
    %142 = vector.extract_strided_slice %139 {offsets = [0, 32], sizes = [8, 32], strides = [1, 1]} : vector<8x128xf32> to vector<8x32xf32>
    %143 = vector.extract_strided_slice %140 {offsets = [0, 64], sizes = [8, 32], strides = [1, 1]} : vector<8x128xf32> to vector<8x32xf32>
    %144 = vector.extract_strided_slice %139 {offsets = [0, 96], sizes = [8, 32], strides = [1, 1]} : vector<8x128xf32> to vector<8x32xf32>
    %145 = arith.mulf %142, %128 : vector<8x32xf32>
    %146 = arith.mulf %141, %143 : vector<8x32xf32>
    %147 = arith.addf %145, %146 : vector<8x32xf32>
    %148 = math.tanh %147 : vector<8x32xf32>
    %149 = arith.mulf %144, %148 : vector<8x32xf32>
    %150 = arith.truncf %149 : vector<8x32xf32> to vector<8x32xbf16>
    %151 = vector.extract_strided_slice %13 {offsets = [56, 0], sizes = [8, 128], strides = [1, 1]} : vector<64x128xf32> to vector<8x128xf32>
    %cst_25 = arith.constant dense<0.000000e+00> : vector<8x128xf32>
    %152 = tpu.matmul %150, %15, %cst_25 {dimension_numbers = #tpu.dot_dimension_numbers<[1], [0], [0], [1], [0, 0, 1, 1], [], []>} : vector<8x32xbf16>, vector<32x128xbf16>, vector<8x128xf32> -> vector<8x128xf32>
    %153 = arith.addf %151, %152 : vector<8x128xf32>
    %154 = arith.negf %153 : vector<8x128xf32>
    %155 = math.exp %154 : vector<8x128xf32>
    %cst_26 = arith.constant 1.000000e+00 : f32
    %156 = vector.broadcast %cst_26 : f32 to vector<8x128xf32>
    %157 = arith.addf %156, %155 : vector<8x128xf32>
    %158 = arith.divf %156, %157 : vector<8x128xf32>
    %159 = math.tanh %153 : vector<8x128xf32>
    %160 = vector.extract_strided_slice %158 {offsets = [0, 0], sizes = [8, 32], strides = [1, 1]} : vector<8x128xf32> to vector<8x32xf32>
    %161 = vector.extract_strided_slice %158 {offsets = [0, 32], sizes = [8, 32], strides = [1, 1]} : vector<8x128xf32> to vector<8x32xf32>
    %162 = vector.extract_strided_slice %159 {offsets = [0, 64], sizes = [8, 32], strides = [1, 1]} : vector<8x128xf32> to vector<8x32xf32>
    %163 = vector.extract_strided_slice %158 {offsets = [0, 96], sizes = [8, 32], strides = [1, 1]} : vector<8x128xf32> to vector<8x32xf32>
    %164 = arith.mulf %161, %147 : vector<8x32xf32>
    %165 = arith.mulf %160, %162 : vector<8x32xf32>
    %166 = arith.addf %164, %165 : vector<8x32xf32>
    %167 = math.tanh %166 : vector<8x32xf32>
    %168 = arith.mulf %163, %167 : vector<8x32xf32>
    %169 = arith.truncf %168 : vector<8x32xf32> to vector<8x32xbf16>
    %cst_27 = arith.constant 0.000000e+00 : f32
    %170 = vector.broadcast %cst_27 : f32 to vector<8x32xf32>
    %171 = arith.negf %14 : vector<8x128xf32>
    %172 = math.exp %171 : vector<8x128xf32>
    %cst_28 = arith.constant 1.000000e+00 : f32
    %173 = vector.broadcast %cst_28 : f32 to vector<8x128xf32>
    %174 = arith.addf %173, %172 : vector<8x128xf32>
    %175 = arith.divf %173, %174 : vector<8x128xf32>
    %176 = math.tanh %14 : vector<8x128xf32>
    %177 = vector.extract_strided_slice %175 {offsets = [0, 0], sizes = [8, 32], strides = [1, 1]} : vector<8x128xf32> to vector<8x32xf32>
    %178 = vector.extract_strided_slice %175 {offsets = [0, 32], sizes = [8, 32], strides = [1, 1]} : vector<8x128xf32> to vector<8x32xf32>
    %179 = vector.extract_strided_slice %176 {offsets = [0, 64], sizes = [8, 32], strides = [1, 1]} : vector<8x128xf32> to vector<8x32xf32>
    %180 = vector.extract_strided_slice %175 {offsets = [0, 96], sizes = [8, 32], strides = [1, 1]} : vector<8x128xf32> to vector<8x32xf32>
    %181 = arith.mulf %178, %170 : vector<8x32xf32>
    %182 = arith.mulf %177, %179 : vector<8x32xf32>
    %183 = arith.addf %181, %182 : vector<8x32xf32>
    %184 = math.tanh %183 : vector<8x32xf32>
    %185 = arith.mulf %180, %184 : vector<8x32xf32>
    %c0_29 = arith.constant 0 : index
    %c0_30 = arith.constant 0 : index
    %186 = vector.load %arg3[%c0_29, %c0_30] : memref<64x128xbf16, #tpu.memory_space<vmem>>, vector<64x128xbf16>
    %187 = vector.extract_strided_slice %186 {offsets = [0, 0], sizes = [32, 128], strides = [1, 1]} : vector<64x128xbf16> to vector<32x128xbf16>
    %cst_31 = arith.constant dense<0.000000e+00> : vector<8x128xf32>
    %188 = tpu.matmul %169, %187, %cst_31 {dimension_numbers = #tpu.dot_dimension_numbers<[1], [0], [0], [1], [0, 0, 1, 1], [], []>} : vector<8x32xbf16>, vector<32x128xbf16>, vector<8x128xf32> -> vector<8x128xf32>
    %189 = arith.truncf %185 : vector<8x32xf32> to vector<8x32xbf16>
    %190 = vector.extract_strided_slice %186 {offsets = [32, 0], sizes = [32, 128], strides = [1, 1]} : vector<64x128xbf16> to vector<32x128xbf16>
    %cst_32 = arith.constant dense<0.000000e+00> : vector<8x128xf32>
    %191 = tpu.matmul %189, %190, %cst_32 {dimension_numbers = #tpu.dot_dimension_numbers<[1], [0], [0], [1], [0, 0, 1, 1], [], []>} : vector<8x32xbf16>, vector<32x128xbf16>, vector<8x128xf32> -> vector<8x128xf32>
    %192 = arith.addf %188, %191 : vector<8x128xf32>
    %c0_33 = arith.constant 0 : index
    %c256 = arith.constant 256 : index
    %193 = vector.load %arg4[%c0_33, %c256] : memref<1x384xf32, #tpu.memory_space<vmem>>, vector<1x128xf32>
    %194 = vector.broadcast %193 : vector<1x128xf32> to vector<8x128xf32>
    %195 = arith.addf %192, %194 : vector<8x128xf32>
    %196 = arith.negf %195 : vector<8x128xf32>
    %197 = math.exp %196 : vector<8x128xf32>
    %cst_34 = arith.constant 1.000000e+00 : f32
    %198 = vector.broadcast %cst_34 : f32 to vector<8x128xf32>
    %199 = arith.addf %198, %197 : vector<8x128xf32>
    %200 = arith.divf %198, %199 : vector<8x128xf32>
    %c0_35 = arith.constant 0 : index
    %c0_36 = arith.constant 0 : index
    %201 = vector.load %arg5[%c0_35, %c0_36] : memref<8x128xf32, #tpu.memory_space<vmem>>, vector<8x128xf32>
    tpu.vector_store %arg5[%c0_35, %c0_36], %200 {strides = array<i32>} : memref<8x128xf32, #tpu.memory_space<vmem>>, vector<8x128xf32>,
    return
  }
}

</mosaic_0001>

<bundles_post_ra>
// kernel: tpu_custom_call.1
= control target key start
LH: loop header
LB: loop body
LE: loop exit
PB: predicated region body
PF: predicated region fallthrough
CT: control target
= control target key end

     0   :  { %10 = vsyncpa [#allocation3], 0  ;;  %s1351_s0 = inlined_call_operand.vmem [shape: s32[64,1], index: 0, kind: input, shape index: {}]   ;;  %s1352_s1 = inlined_call_operand.hbm [shape: bf16[128,256], index: 1, kind: input, shape index: {}]   ;;  %s1353_s2 = inlined_call_operand.vmem [shape: bf16[32,128], index: 2, kind: input, shape index: {}]   ;;  %s1354_s3 = inlined_call_operand.vmem [shape: bf16[64,128], index: 3, kind: input, shape index: {}]   ;;  %s1355_s4 = inlined_call_operand.vmem [shape: f32[1,384], index: 4, kind: input, shape index: {}]   ;;  %s1356_s5 = inlined_call_operand.hbm [shape: f32[8,128], index: 5, kind: output, shape index: {}]  }
   0x1   :  { %11 = vsyncpa [#allocation4], 0  ;;  %s18_s20 = sshll.u32 %s1352_s1, 4  ;;  %s1158_s21 = smov [#allocation2]   ;;  %s19_s20 = int_to_ptr.hbm [resolvable:$true] %s18_s20 }
   0x2   :  { %s20_s22 = sshll.u32 %s1158_s21, 4  ;;  %s1159_s23 = smov 128   ;;  %s21_s22 = int_to_ptr.vmem [resolvable:$true] %s20_s22 }
   0x3   :  { %s1160_s24 = smov 8  }
   0x4   :  { %26 = dma.hbm_to_vmem [thread:$0]  %s19_s20, 2048, %s21_s22, [#allocation3], %s1159_s23, %s1159_s23, %s1160_s24  }
   0x5   :  { %1154 = dma.done.wait [#allocation3], 2048  }
   0x6   :  { %1155 = vsyncadd [#allocation3], 4294965248  ;;  %v1161_v0 = vmov 0   ;;  %v38_v1 = vld [vmem:[%s1351_s0] sm:$0xff]  ;;  %v931_v2 = vld [vmem:[#allocation2 + $0x70] sm:$0xf]  ;;  %v46_v54 = vlaneseq }
   0x7   :  { %1026 = vset.pattern.permute.xlu0 %v1161_v0  ;;  %1027 = vset.pattern.permute.xlu1 %v1161_v0  ;;  %v1011_v3 = vld [vmem:[#allocation2 + $0x74] sm:$0xf0]  ;;  %v1010_v4 = vld [vmem:[#allocation2 + $0x74] sm:$0xf]  ;;  %v933_v5 = vld [vmem:[#allocation2 + $0x78] sm:$0xf0] }
   0x8   :  { %1028 = vset.pattern.permute.xlu2 %v1161_v0  ;;  %49 = vperm.xlu0 %1026, %v38_v1   ;;  %v932_v6 = vor.u32 %v1011_v3, %v931_v2  ;;  %v936_v7 = vor.u32 %v1010_v4, %v933_v5  ;;  %v923_v8 = vld [vmem:[#allocation2 + $0x60] sm:$0xf]  ;;  %v1009_v9 = vld [vmem:[#allocation2 + $0x64] sm:$0xf0]  ;;  %v1008_v10 = vld [vmem:[#allocation2 + $0x64] sm:$0xf] }
   0x9   :  { %v925_v11 = vld [vmem:[#allocation2 + $0x68] sm:$0xf0]  ;;  %v924_v12 = vor.u32 %v1009_v9, %v923_v8  ;;  %v915_v14 = vld [vmem:[#allocation2 + $0x50] sm:$0xf]  ;;  %v1007_v15 = vld [vmem:[#allocation2 + $0x54] sm:$0xf0] }
   0xa   :  { %194 = vmatpush.bf16.msra.mxu0 %v932_v6  ;;  %223 = vmatpush.bf16.msra.mxu1 %v936_v7  ;;  %v928_v13 = vor.u32 %v1008_v10, %v925_v11  ;;  %v1006_v16 = vld [vmem:[#allocation2 + $0x54] sm:$0xf]  ;;  %v917_v17 = vld [vmem:[#allocation2 + $0x58] sm:$0xf0]  ;;  %v39_v18 = vld [vmem:[%s1351_s0 + $0x8] sm:$0xff]  ;;  %v916_v20 = vor.u32 %v1007_v15, %v915_v14  ;;  %v1225_v55 = vand.u32 127, %v46_v54 }
   0xb   :  { %v1208_v19 = vld [vmem:[%s1353_s2 + $0x8] sm:$0xff]  ;;  %v920_v21 = vor.u32 %v1006_v16, %v917_v17  ;;  %v907_v22 = vld [vmem:[#allocation2 + $0x40] sm:$0xf]  ;;  %v1004_v24 = vld [vmem:[#allocation2 + $0x44] sm:$0xf]  ;;  %s1163_s8 = smov 64  }
   0xc   :  { %v1005_v23 = vld [vmem:[#allocation2 + $0x44] sm:$0xf0]  ;;  %v909_v25 = vld [vmem:[#allocation2 + $0x48] sm:$0xf0]  ;;  %271 = vmatpush.bf16.msra.mxu2 %v1208_v19  ;;  %v1214_v26 = vld [vmem:[%s1353_s2] sm:$0xff]  ;;  %329 = vmatpush.bf16.msra.mxu3 %v1208_v19  ;;  %s1164_s9 = smov 32  }
   0xd   :  { %v908_v27 = vor.u32 %v1005_v23, %v907_v22  ;;  %v912_v28 = vor.u32 %v1004_v24, %v909_v25  ;;  %v899_v29 = vld [vmem:[#allocation2 + $0x30] sm:$0xf]  ;;  %v1003_v30 = vld [vmem:[#allocation2 + $0x34] sm:$0xf0]  ;;  %v1002_v31 = vld [vmem:[#allocation2 + $0x34] sm:$0xf] }
   0xe   :  { %195 = vmatpush.bf16.msra.mxu0 %v924_v12  ;;  %224 = vmatpush.bf16.msra.mxu1 %v928_v13  ;;  %v901_v32 = vld [vmem:[#allocation2 + $0x38] sm:$0xf0]  ;;  %v900_v33 = vor.u32 %v1003_v30, %v899_v29  ;;  %v891_v35 = vld [vmem:[#allocation2 + $0x20] sm:$0xf]  ;;  %v1001_v36 = vld [vmem:[#allocation2 + $0x24] sm:$0xf0] }
   0xf   :  { %v904_v34 = vor.u32 %v1002_v31, %v901_v32  ;;  %v1000_v37 = vld [vmem:[#allocation2 + $0x24] sm:$0xf]  ;;  %v893_v38 = vld [vmem:[#allocation2 + $0x28] sm:$0xf0]  ;;  %v892_v39 = vor.u32 %v1001_v36, %v891_v35  ;;  %v883_v41 = vld [vmem:[#allocation2 + $0x10] sm:$0xf] }
  0x10   :  { %52 = vperm.xlu0 %1026, %v39_v18   ;;  %272 = vmatpush.bf16.msra.mxu2 %v1214_v26  ;;  %v896_v40 = vor.u32 %v1000_v37, %v893_v38  ;;  %v999_v42 = vld [vmem:[#allocation2 + $0x14] sm:$0xf0]  ;;  %v998_v43 = vld [vmem:[#allocation2 + $0x14] sm:$0xf]  ;;  %v885_v45 = vld [vmem:[#allocation2 + $0x18] sm:$0xf0] }
  0x11   :  { %330 = vmatpush.bf16.msra.mxu3 %v1214_v26  ;;  %v884_v44 = vor.u32 %v999_v42, %v883_v41  ;;  %v875_v46 = vld [vmem:[#allocation2] sm:$0xf]  ;;  %v997_v47 = vld [vmem:[#allocation2 + $0x4] sm:$0xf0]  ;;  %v888_v48 = vor.u32 %v998_v43, %v885_v45  ;;  %v996_v49 = vld [vmem:[#allocation2 + $0x4] sm:$0xf] }
  0x12   :  { %196 = vmatpush.bf16.msra.mxu0 %v916_v20  ;;  %225 = vmatpush.bf16.msra.mxu1 %v920_v21  ;;  %v877_v50 = vld [vmem:[#allocation2 + $0x8] sm:$0xf0]  ;;  %v876_v51 = vor.u32 %v997_v47, %v875_v46  ;;  %v1162_v57 = vmov 1.0|1.0   ;;  %v1234_v60 = vld [vmem:[%s1355_s4] sm:$0x3] }
  0x13   :  { %273 = vmatmul.bf16.vlgmr.msra.gmra.mxu2 %v1161_v0  ;;  %v880_v52 = vor.u32 %v996_v49, %v877_v50  ;;  %v1237_v61 = vperm.slane %v1234_v60, 0  ;;  %vm261_vm7 = vcmask 261120   ;;  %v40_v50 = vld [vmem:[%s1351_s0 + $0x10] sm:$0xff]  ;;  %s863_s2 = sshll.u32 %s1356_s5, 4  ;;  %s864_s2 = int_to_ptr.hbm [resolvable:$true] %s863_s2 }
  0x14   :  { %387 = vmatpush.bf16.msrb.mxu2 %v1208_v19 }
  0x15   :  { %445 = vmatpush.bf16.msrb.mxu3 %v1208_v19 }
  0x16   :  { %197 = vmatpush.bf16.msra.mxu0 %v908_v27  ;;  %226 = vmatpush.bf16.msra.mxu1 %v912_v28 }
  0x18   :  { %388 = vmatpush.bf16.msrb.mxu2 %v1214_v26 }
  0x19   :  { %446 = vmatpush.bf16.msrb.mxu3 %v1214_v26 }
  0x1a   :  { %198 = vmatpush.bf16.msra.mxu0 %v900_v33  ;;  %227 = vmatpush.bf16.msra.mxu1 %v904_v34 }
  0x1c   :  { %503 = vmatpush.bf16.msra.mxu2 %v1208_v19 }
  0x1e   :  { %199 = vmatpush.bf16.msra.mxu0 %v892_v39  ;;  %228 = vmatpush.bf16.msra.mxu1 %v896_v40 }
  0x20   :  { %504 = vmatpush.bf16.msra.mxu2 %v1214_v26 }
  0x22   :  { %200 = vmatpush.bf16.msra.mxu0 %v884_v44  ;;  %229 = vmatpush.bf16.msra.mxu1 %v888_v48 }
  0x26   :  { %201 = vmatpush.bf16.msra.mxu0 %v876_v51  ;;  %230 = vmatpush.bf16.msra.mxu1 %v880_v52 }
  0x7a   :  { %v50_v53 = vpop.permute.xlu0 %49 }
  0x7b   :  { %vm72_vm0 = vcmp.eq.s32.totalorder %v1225_v55, %v50_v53 }
  0x82   :  { %v53_v56 = vpop.permute.xlu0 %52 }
  0x83   :  { %vm73_vm1 = vcmp.eq.s32.totalorder %v1225_v55, %v53_v56  ;;  %v41_v56 = vld [vmem:[%s1351_s0 + $0x18] sm:$0xff] }
  0x84   :  { %vm937_vm2 = vmpackc.low %vm73_vm1, %vm72_vm0 }
  0x85   :  { %938 = vmatmul.msk.bf16.vlgmr.msra.gmra.mxu0 %vm937_vm2, %v1162_v57  ;;  %946 = vmatmul.msk.bf16.vlgmr.msra.gmra.mxu1 %vm937_vm2, %v1162_v57 }
  0x96   :  { %v274_v58 = vpop.f32.mrf.mxu2 }
  0x9e   :  { %v276_v59 = vpop.f32.mrf.mxu2 }
 0x102   :  { %v203_v62 = vpop.f32.mrf.mxu0  ;;  %v232_v63 = vpop.f32.mrf.mxu1 }
 0x103   :  { %v204_v0 = vadd.f32 %v203_v62, %v1237_v61 }
 0x105   :  { %v278_v1 = vadd.f32 %v274_v58, %v204_v0 }
 0x107   :  { %1030 = vtanh.f32 %v278_v1  ;;  %v961_v4 = vmul.f32 -1.442695, %v278_v1 }
 0x109   :  { %1032 = vpow2.f32 %v961_v4 }
 0x10a   :  { %v233_v2 = vpop.f32.mrf.mxu1  ;;  %v205_v29 = vpop.f32.mrf.mxu0 }
 0x10b   :  { %v206_v30 = vadd.f32 %v205_v29, %v1237_v61 }
 0x10d   :  { %v1031_v3 = vpop.eup %1030 }
 0x10e   :  { %301 = vrot.lane.b32.xlu1 %v1031_v3, %s1163_s8 }
 0x10f   :  { %v1033_v5 = vpop.eup %1032 }
 0x110   :  { %v282_v6 = vadd.f32 1.0, %v1033_v5 }
 0x112   :  { %1034 = vrcp.f32 %v282_v6  ;;  %v294_v12 = vand.u32 2147483648, %v282_v6  ;;  %vm288_vm4 = vweird.f32 %v282_v6  ;;  %v292_v13 = vand.u32 2147483647, %v282_v6 }
 0x114   :  { %v295_v15 = vor.u32 1.1754944e-38, %v294_v12  ;;  %vm293_vm6 = vcmp.eq.f32.partialorder %v292_v13, 8.507059e+37 }
 0x118   :  { %v1035_v7 = vpop.eup %1034 }
 0x119   :  { %v284_v8 = vmul.f32 %v1035_v7, %v282_v6  ;;  %vm289_vm3 = vweird.f32 %v1035_v7 }
 0x11a   :  { %vm290_vm5 = vmor %vm288_vm4, %vm289_vm3 }
 0x11b   :  { %v285_v9 = vsub.f32 1.0, %v284_v8 }
 0x11d   :  { %v286_v10 = vmul.f32 %v1035_v7, %v285_v9 }
 0x11f   :  { %v287_v11 = vadd.f32 %v1035_v7, %v286_v10 }
 0x121   :  { %v291_v14 = vsel %vm290_vm5, %v1035_v7, %v287_v11 }
 0x122   :  { %v296_v17 = vsel %vm293_vm6, %v295_v15, %v291_v14 }
 0x123   :  { %v299_v20 = vmul.f32 0.0, %v296_v17 }
 0x180   :  { %v302_v16 = vpop.permute.xlu1 %301 }
 0x181   :  { %v304_v18 = vmul.f32 %v302_v16, %v296_v17 }
 0x183   :  { %306 = vrot.lane.b32.xlu1 %v304_v18, %s1164_s9 }
 0x1f5   :  { %v307_v21 = vpop.permute.xlu1 %306 }
 0x1f6   :  { %v309_v22 = vadd.f32 %v307_v21, %v299_v20 }
 0x1f8   :  { %1036 = vtanh.f32 %v309_v22 }
 0x1fe   :  { %v1037_v23 = vpop.eup %1036 }
 0x1ff   :  { %312 = vrot.lane.b32.xlu2 %v1037_v23, %s1163_s8 }
 0x259   :  { %v313_v24 = vpop.permute.xlu2 %312 }
 0x25a   :  { %v315_v25 = vmul.f32 %v313_v24, %v296_v17 }
 0x25c   :  { %v316_v27 = vpack.c.bf16 %v315_v25, %v315_v25 }
 0x25e   :  { %318 = vrot.lane.b32.xlu2 %v316_v27, %s1164_s9 }
 0x2b8   :  { %v319_v28 = vpop.permute.xlu2 %318 }
 0x2b9   :  { %962 = vmatmul.msk.bf16.vlgmr.msra.gmra.mxu3 %vm261_vm7, %v319_v28 }
 0x2ba   :  { %561 = vmatpush.bf16.msra.mxu3 %v1208_v19 }
 0x2be   :  { %562 = vmatpush.bf16.msra.mxu3 %v1214_v26 }
 0x33c   :  { %v332_v31 = vpop.f32.mrf.mxu3 }
 0x33d   :  { %v336_v32 = vadd.f32 %v332_v31, %v206_v30 }
 0x33f   :  { %1038 = vtanh.f32 %v336_v32  ;;  %v963_v35 = vmul.f32 -1.442695, %v336_v32 }
 0x341   :  { %1040 = vpow2.f32 %v963_v35 }
 0x344   :  { %v334_v33 = vpop.f32.mrf.mxu3 }
 0x345   :  { %v1039_v34 = vpop.eup %1038 }
 0x346   :  { %359 = vrot.lane.b32.xlu0 %v1039_v34, %s1163_s8 }
 0x347   :  { %v1041_v36 = vpop.eup %1040 }
 0x348   :  { %v340_v37 = vadd.f32 1.0, %v1041_v36 }
 0x34a   :  { %1042 = vrcp.f32 %v340_v37  ;;  %v352_v43 = vand.u32 2147483648, %v340_v37  ;;  %vm346_vm9 = vweird.f32 %v340_v37  ;;  %v350_v44 = vand.u32 2147483647, %v340_v37 }
 0x34c   :  { %v353_v46 = vor.u32 1.1754944e-38, %v352_v43  ;;  %vm351_vm11 = vcmp.eq.f32.partialorder %v350_v44, 8.507059e+37 }
 0x350   :  { %v1043_v38 = vpop.eup %1042 }
 0x351   :  { %v342_v39 = vmul.f32 %v1043_v38, %v340_v37  ;;  %vm347_vm8 = vweird.f32 %v1043_v38 }
 0x352   :  { %vm348_vm10 = vmor %vm346_vm9, %vm347_vm8 }
 0x353   :  { %v343_v40 = vsub.f32 1.0, %v342_v39 }
 0x355   :  { %v344_v41 = vmul.f32 %v1043_v38, %v343_v40 }
 0x357   :  { %v345_v42 = vadd.f32 %v1043_v38, %v344_v41 }
 0x359   :  { %v349_v45 = vsel %vm348_vm10, %v1043_v38, %v345_v42 }
 0x35a   :  { %v354_v48 = vsel %vm351_vm11, %v353_v46, %v349_v45 }
 0x35b   :  { %v357_v51 = vmul.f32 %v354_v48, %v309_v22 }
 0x3b8   :  { %v360_v47 = vpop.permute.xlu0 %359 }
 0x3b9   :  { %v362_v49 = vmul.f32 %v360_v47, %v354_v48 }
 0x3bb   :  { %364 = vrot.lane.b32.xlu1 %v362_v49, %s1164_s9 }
 0x3c3   :  { %55 = vperm.xlu1 %1027, %v40_v50  }
 0x42d   :  { %v365_v52 = vpop.permute.xlu1 %364 }
 0x42e   :  { %v367_v53 = vadd.f32 %v365_v52, %v357_v51 }
 0x430   :  { %1044 = vtanh.f32 %v367_v53 }
 0x435   :  { %v56_v63 = vpop.permute.xlu1 %55 }
 0x436   :  { %v1045_v54 = vpop.eup %1044  ;;  %vm74_vm12 = vcmp.eq.s32.totalorder %v1225_v55, %v56_v63  ;;  %v43_v63 = vld [vmem:[%s1351_s0 + $0x28] sm:$0xff] }
 0x437   :  { %370 = vrot.lane.b32.xlu2 %v1045_v54, %s1163_s8  ;;  %v42_v54 = vld [vmem:[%s1351_s0 + $0x20] sm:$0xff] }
 0x43f   :  { %58 = vperm.xlu2 %1028, %v41_v56  }
 0x491   :  { %v371_v58 = vpop.permute.xlu2 %370 }
 0x492   :  { %v373_v59 = vmul.f32 %v371_v58, %v354_v48 }
 0x494   :  { %v374_v62 = vpack.c.bf16 %v373_v59, %v373_v59 }
 0x496   :  { %376 = vrot.lane.b32.xlu0 %v374_v62, %s1164_s9 }
 0x499   :  { %v59_v0 = vpop.permute.xlu2 %58 }
 0x49a   :  { %vm75_vm13 = vcmp.eq.s32.totalorder %v1225_v55, %v59_v0 }
 0x49b   :  { %vm939_vm14 = vmpackc.low %vm75_vm13, %vm74_vm12 }
 0x49c   :  { %940 = vmatmul.msk.bf16.gmra.mxu0 %vm939_vm14, %v1162_v57  ;;  %948 = vmatmul.msk.bf16.gmra.mxu1 %vm939_vm14, %v1162_v57 }
 0x508   :  { %v377_v1 = vpop.permute.xlu0 %376 }
 0x509   :  { %964 = vmatmul.msk.bf16.vlgmr.msrb.gmra.mxu2 %vm261_vm7, %v377_v1 }
 0x50a   :  { %619 = vmatpush.bf16.msrb.mxu2 %v1208_v19 }
 0x50e   :  { %620 = vmatpush.bf16.msrb.mxu2 %v1214_v26 }
 0x519   :  { %v235_v2 = vpop.f32.mrf.mxu1  ;;  %v208_v4 = vpop.f32.mrf.mxu0 }
 0x51a   :  { %v209_v5 = vadd.f32 %v208_v4, %v1237_v61 }
 0x521   :  { %v236_v3 = vpop.f32.mrf.mxu1  ;;  %v210_v35 = vpop.f32.mrf.mxu0 }
 0x522   :  { %v211_v36 = vadd.f32 %v210_v35, %v1237_v61 }
 0x58c   :  { %v390_v6 = vpop.f32.mrf.mxu2 }
 0x58d   :  { %v394_v7 = vadd.f32 %v390_v6, %v209_v5 }
 0x58f   :  { %1046 = vtanh.f32 %v394_v7  ;;  %v965_v10 = vmul.f32 -1.442695, %v394_v7 }
 0x591   :  { %1048 = vpow2.f32 %v965_v10 }
 0x594   :  { %v392_v8 = vpop.f32.mrf.mxu2 }
 0x595   :  { %v1047_v9 = vpop.eup %1046 }
 0x596   :  { %417 = vrot.lane.b32.xlu0 %v1047_v9, %s1163_s8 }
 0x597   :  { %v1049_v11 = vpop.eup %1048 }
 0x598   :  { %v398_v12 = vadd.f32 1.0, %v1049_v11 }
 0x59a   :  { %1050 = vrcp.f32 %v398_v12  ;;  %v410_v18 = vand.u32 2147483648, %v398_v12  ;;  %vm404_vm0 = vweird.f32 %v398_v12  ;;  %v408_v20 = vand.u32 2147483647, %v398_v12 }
 0x59c   :  { %v411_v22 = vor.u32 1.1754944e-38, %v410_v18  ;;  %vm409_vm2 = vcmp.eq.f32.partialorder %v408_v20, 8.507059e+37 }
 0x5a0   :  { %v1051_v13 = vpop.eup %1050 }
 0x5a1   :  { %v400_v14 = vmul.f32 %v1051_v13, %v398_v12  ;;  %vm405_vm15 = vweird.f32 %v1051_v13 }
 0x5a2   :  { %vm406_vm1 = vmor %vm404_vm0, %vm405_vm15 }
 0x5a3   :  { %v401_v15 = vsub.f32 1.0, %v400_v14 }
 0x5a5   :  { %v402_v16 = vmul.f32 %v1051_v13, %v401_v15 }
 0x5a7   :  { %v403_v17 = vadd.f32 %v1051_v13, %v402_v16 }
 0x5a9   :  { %v407_v21 = vsel %vm406_vm1, %v1051_v13, %v403_v17 }
 0x5aa   :  { %v412_v24 = vsel %vm409_vm2, %v411_v22, %v407_v21 }
 0x5ab   :  { %v415_v27 = vmul.f32 %v412_v24, %v367_v53 }
 0x608   :  { %v418_v23 = vpop.permute.xlu0 %417 }
 0x609   :  { %v420_v25 = vmul.f32 %v418_v23, %v412_v24 }
 0x60b   :  { %422 = vrot.lane.b32.xlu1 %v420_v25, %s1164_s9 }
 0x67d   :  { %v423_v28 = vpop.permute.xlu1 %422 }
 0x67e   :  { %v425_v29 = vadd.f32 %v423_v28, %v415_v27 }
 0x680   :  { %1052 = vtanh.f32 %v425_v29 }
 0x686   :  { %v1053_v30 = vpop.eup %1052 }
 0x687   :  { %428 = vrot.lane.b32.xlu2 %v1053_v30, %s1163_s8 }
 0x6e1   :  { %v429_v31 = vpop.permute.xlu2 %428 }
 0x6e2   :  { %v431_v32 = vmul.f32 %v429_v31, %v412_v24 }
 0x6e4   :  { %v432_v33 = vpack.c.bf16 %v431_v32, %v431_v32 }
 0x6e6   :  { %434 = vrot.lane.b32.xlu0 %v432_v33, %s1164_s9 }
 0x758   :  { %v435_v34 = vpop.permute.xlu0 %434 }
 0x759   :  { %966 = vmatmul.msk.bf16.vlgmr.msrb.gmra.mxu3 %vm261_vm7, %v435_v34 }
 0x75a   :  { %677 = vmatpush.bf16.msrb.mxu3 %v1208_v19 }
 0x75e   :  { %678 = vmatpush.bf16.msrb.mxu3 %v1214_v26 }
 0x7dc   :  { %v448_v37 = vpop.f32.mrf.mxu3 }
 0x7dd   :  { %v452_v38 = vadd.f32 %v448_v37, %v211_v36 }
 0x7df   :  { %1054 = vtanh.f32 %v452_v38  ;;  %v967_v41 = vmul.f32 -1.442695, %v452_v38 }
 0x7e1   :  { %1056 = vpow2.f32 %v967_v41 }
 0x7e4   :  { %v450_v39 = vpop.f32.mrf.mxu3 }
 0x7e5   :  { %v1055_v40 = vpop.eup %1054 }
 0x7e6   :  { %475 = vrot.lane.b32.xlu1 %v1055_v40, %s1163_s8 }
 0x7e7   :  { %v1057_v42 = vpop.eup %1056 }
 0x7e8   :  { %v456_v43 = vadd.f32 1.0, %v1057_v42 }
 0x7ea   :  { %1058 = vrcp.f32 %v456_v43  ;;  %v468_v47 = vand.u32 2147483648, %v456_v43  ;;  %vm462_vm4 = vweird.f32 %v456_v43  ;;  %v466_v48 = vand.u32 2147483647, %v456_v43 }
 0x7ec   :  { %v469_v50 = vor.u32 1.1754944e-38, %v468_v47  ;;  %vm467_vm6 = vcmp.eq.f32.partialorder %v466_v48, 8.507059e+37 }
 0x7f0   :  { %v1059_v44 = vpop.eup %1058 }
 0x7f1   :  { %v458_v45 = vmul.f32 %v1059_v44, %v456_v43  ;;  %vm463_vm3 = vweird.f32 %v1059_v44 }
 0x7f2   :  { %vm464_vm5 = vmor %vm462_vm4, %vm463_vm3 }
 0x7f3   :  { %v459_v19 = vsub.f32 1.0, %v458_v45 }
 0x7f5   :  { %v460_v46 = vmul.f32 %v1059_v44, %v459_v19 }
 0x7f7   :  { %v461_v26 = vadd.f32 %v1059_v44, %v460_v46 }
 0x7f9   :  { %v465_v49 = vsel %vm464_vm5, %v1059_v44, %v461_v26 }
 0x7fa   :  { %v470_v52 = vsel %vm467_vm6, %v469_v50, %v465_v49 }
 0x7fb   :  { %v473_v56 = vmul.f32 %v470_v52, %v425_v29 }
 0x858   :  { %v476_v51 = vpop.permute.xlu1 %475 }
 0x859   :  { %v478_v53 = vmul.f32 %v476_v51, %v470_v52 }
 0x85b   :  { %480 = vrot.lane.b32.xlu2 %v478_v53, %s1164_s9 }
 0x863   :  { %61 = vperm.xlu2 %1028, %v42_v54  }
 0x8b5   :  { %v481_v58 = vpop.permute.xlu2 %480 }
 0x8b6   :  { %v483_v59 = vadd.f32 %v481_v58, %v473_v56 }
 0x8b8   :  { %1060 = vtanh.f32 %v483_v59 }
 0x8bd   :  { %v62_v3 = vpop.permute.xlu2 %61 }
 0x8be   :  { %v1061_v62 = vpop.eup %1060  ;;  %vm76_vm8 = vcmp.eq.s32.totalorder %v1225_v55, %v62_v3  ;;  %v45_v3 = vld [vmem:[%s1351_s0 + $0x38] sm:$0xff] }
 0x8bf   :  { %486 = vrot.lane.b32.xlu0 %v1061_v62, %s1163_s8  ;;  %v44_v62 = vld [vmem:[%s1351_s0 + $0x30] sm:$0xff] }
 0x8c7   :  { %64 = vperm.xlu0 %1026, %v43_v63  }
 0x931   :  { %v487_v0 = vpop.permute.xlu0 %486 }
 0x932   :  { %v489_v1 = vmul.f32 %v487_v0, %v470_v52 }
 0x934   :  { %v490_v2 = vpack.c.bf16 %v489_v1, %v489_v1 }
 0x936   :  { %492 = vrot.lane.b32.xlu1 %v490_v2, %s1164_s9 }
 0x939   :  { %v65_v4 = vpop.permute.xlu0 %64 }
 0x93a   :  { %vm77_vm9 = vcmp.eq.s32.totalorder %v1225_v55, %v65_v4 }
 0x93b   :  { %vm941_vm10 = vmpackc.low %vm77_vm9, %vm76_vm8 }
 0x93c   :  { %942 = vmatmul.msk.bf16.gmra.mxu0 %vm941_vm10, %v1162_v57  ;;  %950 = vmatmul.msk.bf16.gmra.mxu1 %vm941_vm10, %v1162_v57 }
 0x9a8   :  { %v493_v5 = vpop.permute.xlu1 %492 }
 0x9a9   :  { %968 = vmatmul.msk.bf16.vlgmr.msra.gmra.mxu2 %vm261_vm7, %v493_v5 }
 0x9b9   :  { %v238_v6 = vpop.f32.mrf.mxu1  ;;  %v213_v8 = vpop.f32.mrf.mxu0 }
 0x9ba   :  { %v214_v9 = vadd.f32 %v213_v8, %v1237_v61 }
 0x9c1   :  { %v239_v7 = vpop.f32.mrf.mxu1  ;;  %v215_v39 = vpop.f32.mrf.mxu0 }
 0x9c2   :  { %v216_v40 = vadd.f32 %v215_v39, %v1237_v61 }
 0xa2c   :  { %v506_v10 = vpop.f32.mrf.mxu2 }
 0xa2d   :  { %v510_v11 = vadd.f32 %v506_v10, %v214_v9 }
 0xa2f   :  { %1062 = vtanh.f32 %v510_v11  ;;  %v969_v14 = vmul.f32 -1.442695, %v510_v11 }
 0xa31   :  { %1064 = vpow2.f32 %v969_v14 }
 0xa34   :  { %v508_v12 = vpop.f32.mrf.mxu2 }
 0xa35   :  { %v1063_v13 = vpop.eup %1062 }
 0xa36   :  { %533 = vrot.lane.b32.xlu1 %v1063_v13, %s1163_s8 }
 0xa37   :  { %v1065_v15 = vpop.eup %1064 }
 0xa38   :  { %v514_v16 = vadd.f32 1.0, %v1065_v15 }
 0xa3a   :  { %1066 = vrcp.f32 %v514_v16  ;;  %v526_v23 = vand.u32 2147483648, %v514_v16  ;;  %vm520_vm12 = vweird.f32 %v514_v16  ;;  %v524_v24 = vand.u32 2147483647, %v514_v16 }
 0xa3c   :  { %v527_v27 = vor.u32 1.1754944e-38, %v526_v23  ;;  %vm525_vm14 = vcmp.eq.f32.partialorder %v524_v24, 8.507059e+37 }
 0xa40   :  { %v1067_v17 = vpop.eup %1066 }
 0xa41   :  { %v516_v18 = vmul.f32 %v1067_v17, %v514_v16  ;;  %vm521_vm11 = vweird.f32 %v1067_v17 }
 0xa42   :  { %vm522_vm13 = vmor %vm520_vm12, %vm521_vm11 }
 0xa43   :  { %v517_v20 = vsub.f32 1.0, %v516_v18 }
 0xa45   :  { %v518_v21 = vmul.f32 %v1067_v17, %v517_v20 }
 0xa47   :  { %v519_v22 = vadd.f32 %v1067_v17, %v518_v21 }
 0xa49   :  { %v523_v25 = vsel %vm522_vm13, %v1067_v17, %v519_v22 }
 0xa4a   :  { %v528_v29 = vsel %vm525_vm14, %v527_v27, %v523_v25 }
 0xa4b   :  { %v531_v31 = vmul.f32 %v528_v29, %v483_v59 }
 0xaa8   :  { %v534_v28 = vpop.permute.xlu1 %533 }
 0xaa9   :  { %v536_v30 = vmul.f32 %v534_v28, %v528_v29 }
 0xaab   :  { %538 = vrot.lane.b32.xlu2 %v536_v30, %s1164_s9 }
 0xb05   :  { %v539_v32 = vpop.permute.xlu2 %538 }
 0xb06   :  { %v541_v33 = vadd.f32 %v539_v32, %v531_v31 }
 0xb08   :  { %1068 = vtanh.f32 %v541_v33 }
 0xb0e   :  { %v1069_v34 = vpop.eup %1068 }
 0xb0f   :  { %544 = vrot.lane.b32.xlu0 %v1069_v34, %s1163_s8 }
 0xb81   :  { %v545_v35 = vpop.permute.xlu0 %544 }
 0xb82   :  { %v547_v36 = vmul.f32 %v545_v35, %v528_v29  ;;  %v111_v35 = vperm.slane %v1234_v60, 1 }
 0xb84   :  { %v548_v37 = vpack.c.bf16 %v547_v36, %v547_v36 }
 0xb86   :  { %550 = vrot.lane.b32.xlu1 %v548_v37, %s1164_s9 }
 0xbf8   :  { %v551_v38 = vpop.permute.xlu1 %550 }
 0xbf9   :  { %970 = vmatmul.msk.bf16.vlgmr.msra.gmra.mxu3 %vm261_vm7, %v551_v38 }
 0xc7c   :  { %v564_v41 = vpop.f32.mrf.mxu3 }
 0xc7d   :  { %v568_v42 = vadd.f32 %v564_v41, %v216_v40 }
 0xc7f   :  { %1070 = vtanh.f32 %v568_v42  ;;  %v971_v45 = vmul.f32 -1.442695, %v568_v42 }
 0xc81   :  { %1072 = vpow2.f32 %v971_v45 }
 0xc84   :  { %v566_v43 = vpop.f32.mrf.mxu3 }
 0xc85   :  { %v1071_v44 = vpop.eup %1070 }
 0xc86   :  { %591 = vrot.lane.b32.xlu2 %v1071_v44, %s1163_s8 }
 0xc87   :  { %v1073_v19 = vpop.eup %1072 }
 0xc88   :  { %v572_v46 = vadd.f32 1.0, %v1073_v19 }
 0xc8a   :  { %1074 = vrcp.f32 %v572_v46  ;;  %v584_v51 = vand.u32 2147483648, %v572_v46  ;;  %vm578_vm0 = vweird.f32 %v572_v46  ;;  %v582_v52 = vand.u32 2147483647, %v572_v46 }
 0xc8c   :  { %v585_v54 = vor.u32 1.1754944e-38, %v584_v51  ;;  %vm583_vm2 = vcmp.eq.f32.partialorder %v582_v52, 8.507059e+37 }
 0xc90   :  { %v1075_v26 = vpop.eup %1074 }
 0xc91   :  { %v574_v47 = vmul.f32 %v1075_v26, %v572_v46  ;;  %vm579_vm15 = vweird.f32 %v1075_v26 }
 0xc92   :  { %vm580_vm1 = vmor %vm578_vm0, %vm579_vm15 }
 0xc93   :  { %v575_v48 = vsub.f32 1.0, %v574_v47 }
 0xc95   :  { %v576_v49 = vmul.f32 %v1075_v26, %v575_v48 }
 0xc97   :  { %v577_v50 = vadd.f32 %v1075_v26, %v576_v49 }
 0xc99   :  { %v581_v53 = vsel %vm580_vm1, %v1075_v26, %v577_v50 }
 0xc9a   :  { %v586_v58 = vsel %vm583_vm2, %v585_v54, %v581_v53 }
 0xc9b   :  { %v589_v63 = vmul.f32 %v586_v58, %v541_v33 }
 0xce0   :  { %v592_v56 = vpop.permute.xlu2 %591 }
 0xce1   :  { %v594_v59 = vmul.f32 %v592_v56, %v586_v58 }
 0xce3   :  { %596 = vrot.lane.b32.xlu0 %v594_v59, %s1164_s9 }
 0xceb   :  { %67 = vperm.xlu0 %1026, %v44_v62  }
 0xd55   :  { %v597_v0 = vpop.permute.xlu0 %596 }
 0xd56   :  { %v599_v1 = vadd.f32 %v597_v0, %v589_v63 }
 0xd58   :  { %1076 = vtanh.f32 %v599_v1 }
 0xd5d   :  { %v68_v7 = vpop.permute.xlu0 %67 }
 0xd5e   :  { %v1077_v2 = vpop.eup %1076  ;;  %vm78_vm3 = vcmp.eq.s32.totalorder %v1225_v55, %v68_v7 }
 0xd5f   :  { %602 = vrot.lane.b32.xlu1 %v1077_v2, %s1163_s8 }
 0xd67   :  { %70 = vperm.xlu1 %1027, %v45_v3  }
 0xdd1   :  { %v603_v4 = vpop.permute.xlu1 %602 }
 0xdd2   :  { %v605_v5 = vmul.f32 %v603_v4, %v586_v58 }
 0xdd4   :  { %v606_v6 = vpack.c.bf16 %v605_v5, %v605_v5 }
 0xdd6   :  { %608 = vrot.lane.b32.xlu2 %v606_v6, %s1164_s9 }
 0xdd9   :  { %v71_v8 = vpop.permute.xlu1 %70 }
 0xdda   :  { %vm79_vm4 = vcmp.eq.s32.totalorder %v1225_v55, %v71_v8 }
 0xddb   :  { %vm943_vm5 = vmpackc.low %vm79_vm4, %vm78_vm3 }
 0xddc   :  { %944 = vmatmul.msk.bf16.gmra.mxu0 %vm943_vm5, %v1162_v57  ;;  %952 = vmatmul.msk.bf16.gmra.mxu1 %vm943_vm5, %v1162_v57 }
 0xe30   :  { %v609_v9 = vpop.permute.xlu2 %608 }
 0xe31   :  { %972 = vmatmul.msk.bf16.vlgmr.msrb.gmra.mxu2 %vm261_vm7, %v609_v9 }
 0xe59   :  { %v241_v10 = vpop.f32.mrf.mxu1  ;;  %v218_v11 = vpop.f32.mrf.mxu0 }
 0xe5a   :  { %v219_v12 = vadd.f32 %v218_v11, %v1237_v61 }
 0xe61   :  { %v242_v36 = vpop.f32.mrf.mxu1  ;;  %v220_v46 = vpop.f32.mrf.mxu0 }
 0xe62   :  { %v243_v37 = vadd.f32 %v242_v36, %v111_v35  ;;  %v221_v47 = vadd.f32 %v220_v46, %v1237_v61 }
 0xe64   :  { %v976_v60 = vmul.f32 -1.442695, %v243_v37 }
 0xeb4   :  { %v622_v13 = vpop.f32.mrf.mxu2 }
 0xeb5   :  { %v626_v14 = vadd.f32 %v622_v13, %v219_v12 }
 0xeb7   :  { %1078 = vtanh.f32 %v626_v14  ;;  %v973_v55 = vmul.f32 -1.442695, %v626_v14 }
 0xeb9   :  { %1080 = vpow2.f32 %v973_v55 }
 0xebc   :  { %v624_v15 = vpop.f32.mrf.mxu2 }
 0xebd   :  { %v1079_v16 = vpop.eup %1078 }
 0xebe   :  { %649 = vrot.lane.b32.xlu2 %v1079_v16, %s1163_s8 }
 0xebf   :  { %v1081_v17 = vpop.eup %1080 }
 0xec0   :  { %v630_v18 = vadd.f32 1.0, %v1081_v17 }
 0xec2   :  { %1082 = vrcp.f32 %v630_v18  ;;  %v642_v24 = vand.u32 2147483648, %v630_v18  ;;  %vm636_vm8 = vweird.f32 %v630_v18  ;;  %v640_v25 = vand.u32 2147483647, %v630_v18 }
 0xec4   :  { %v643_v28 = vor.u32 1.1754944e-38, %v642_v24  ;;  %vm641_vm10 = vcmp.eq.f32.partialorder %v640_v25, 8.507059e+37 }
 0xec8   :  { %v1083_v57 = vpop.eup %1082 }
 0xec9   :  { %v632_v20 = vmul.f32 %v1083_v57, %v630_v18  ;;  %vm637_vm6 = vweird.f32 %v1083_v57 }
 0xeca   :  { %vm638_vm9 = vmor %vm636_vm8, %vm637_vm6 }
 0xecb   :  { %v633_v21 = vsub.f32 1.0, %v632_v20 }
 0xecd   :  { %v634_v22 = vmul.f32 %v1083_v57, %v633_v21 }
 0xecf   :  { %v635_v23 = vadd.f32 %v1083_v57, %v634_v22 }
 0xed1   :  { %v639_v27 = vsel %vm638_vm9, %v1083_v57, %v635_v23 }
 0xed2   :  { %v644_v30 = vsel %vm641_vm10, %v643_v28, %v639_v27  ;;  %v1017_v27 = vld [vmem:[%s1354_s3 + $0x18] sm:$0xff]  ;;  %v1016_v28 = vld [vmem:[%s1354_s3 + $0x10] sm:$0xff] }
 0xed3   :  { %v647_v32 = vmul.f32 %v644_v30, %v599_v1  ;;  %793 = vmatpush.bf16.msra.mxu2 %v1017_v27 }
 0xed7   :  { %794 = vmatpush.bf16.msra.mxu2 %v1016_v28 }
 0xf18   :  { %v650_v29 = vpop.permute.xlu2 %649 }
 0xf19   :  { %v652_v31 = vmul.f32 %v650_v29, %v644_v30  ;;  %v1015_v29 = vld [vmem:[%s1354_s3 + $0x8] sm:$0xff] }
 0xf1a   :  { %824 = vmatpush.bf16.msra.mxu3 %v1015_v29 }
 0xf1b   :  { %654 = vrot.lane.b32.xlu0 %v652_v31, %s1164_s9 }
 0xf8d   :  { %v655_v33 = vpop.permute.xlu0 %654 }
 0xf8e   :  { %v1314_v34 = vadd.f32 %v655_v33, %v647_v32 }
 0xf90   :  { %1084 = vtanh.f32 %v1314_v34 }
 0xf91   :  { %1086 = vtanh.f32 %v243_v37 }
 0xf92   :  { %1088 = vpow2.f32 %v976_v60 }
 0xf96   :  { %v1085_v38 = vpop.eup %1084 }
 0xf97   :  { %660 = vrot.lane.b32.xlu1 %v1085_v38, %s1163_s8  ;;  %v1087_v39 = vpop.eup %1086  ;;  %v1029_v38 = vld [vmem:[%s1355_s4 + $0x2] ss:$0 sm:$0xff] }
 0xf98   :  { %v1089_v44 = vpop.eup %1088 }
 0xf99   :  { %v726_v45 = vadd.f32 1.0, %v1089_v44 }
 0xf9b   :  { %1090 = vrcp.f32 %v726_v45  ;;  %v738_v56 = vand.u32 2147483648, %v726_v45  ;;  %vm732_vm12 = vweird.f32 %v726_v45  ;;  %v736_v58 = vand.u32 2147483647, %v726_v45 }
 0xf9d   :  { %v739_v62 = vor.u32 1.1754944e-38, %v738_v56  ;;  %vm737_vm14 = vcmp.eq.f32.partialorder %v736_v58, 8.507059e+37 }
 0xf9f   :  { %745 = vrot.lane.b32.xlu1 %v1087_v39, %s1163_s8 }
 0xfa1   :  { %v1091_v19 = vpop.eup %1090 }
 0xfa2   :  { %v728_v26 = vmul.f32 %v1091_v19, %v726_v45  ;;  %vm733_vm11 = vweird.f32 %v1091_v19 }
 0xfa3   :  { %vm734_vm13 = vmor %vm732_vm12, %vm733_vm11 }
 0xfa4   :  { %v729_v48 = vsub.f32 1.0, %v728_v26 }
 0xfa6   :  { %v730_v51 = vmul.f32 %v1091_v19, %v729_v48 }
 0xfa8   :  { %v731_v52 = vadd.f32 %v1091_v19, %v730_v51 }
 0xfaa   :  { %v735_v59 = vsel %vm734_vm13, %v1091_v19, %v731_v52 }
 0xfab   :  { %v740_v61 = vsel %vm737_vm14, %v739_v62, %v735_v59 }
 0xfac   :  { %v743_v16 = vmul.f32 0.0, %v740_v61 }
0x1009   :  { %v661_v40 = vpop.permute.xlu1 %660 }
0x100a   :  { %v663_v41 = vmul.f32 %v661_v40, %v644_v30  ;;  %v1014_v30 = vld [vmem:[%s1354_s3] sm:$0xff]  ;;  %s1165_s3 = smov [#allocation5]  }
0x100b   :  { %825 = vmatpush.bf16.msra.mxu3 %v1014_v30  ;;  %s861_s30 = sshll.u32 %s1165_s3, 4  ;;  %s862_s30 = int_to_ptr.vmem [resolvable:$true] %s861_s30 }
0x100c   :  { %v664_v42 = vpack.c.bf16 %v663_v41, %v663_v41 }
0x100e   :  { %666 = vrot.lane.b32.xlu2 %v664_v42, %s1164_s9 }
0x1011   :  { %v746_v63 = vpop.permute.xlu1 %745 }
0x1012   :  { %v748_v0 = vmul.f32 %v746_v63, %v740_v61 }
0x1068   :  { %v667_v43 = vpop.permute.xlu2 %666 }
0x1069   :  { %974 = vmatmul.msk.bf16.vlgmr.msrb.gmra.mxu3 %vm261_vm7, %v667_v43 }
0x10ec   :  { %v680_v49 = vpop.f32.mrf.mxu3 }
0x10ed   :  { %v684_v50 = vadd.f32 %v680_v49, %v221_v47 }
0x10ef   :  { %1092 = vtanh.f32 %v684_v50  ;;  %v975_v1 = vmul.f32 -1.442695, %v684_v50 }
0x10f1   :  { %1094 = vpow2.f32 %v975_v1 }
0x10f4   :  { %v682_v53 = vpop.f32.mrf.mxu3 }
0x10f5   :  { %v1093_v54 = vpop.eup %1092 }
0x10f6   :  { %707 = vrot.lane.b32.xlu0 %v1093_v54, %s1163_s8 }
0x10f7   :  { %v1095_v2 = vpop.eup %1094 }
0x10f8   :  { %v688_v3 = vadd.f32 1.0, %v1095_v2 }
0x10fa   :  { %1096 = vrcp.f32 %v688_v3  ;;  %v700_v9 = vand.u32 2147483648, %v688_v3  ;;  %vm694_vm0 = vweird.f32 %v688_v3  ;;  %v698_v10 = vand.u32 2147483647, %v688_v3 }
0x10fc   :  { %v701_v12 = vor.u32 1.1754944e-38, %v700_v9  ;;  %vm699_vm2 = vcmp.eq.f32.partialorder %v698_v10, 8.507059e+37 }
0x10fe   :  { %750 = vrot.lane.b32.xlu0 %v748_v0, %s1164_s9 }
0x1100   :  { %v1097_v4 = vpop.eup %1096 }
0x1101   :  { %v690_v5 = vmul.f32 %v1097_v4, %v688_v3  ;;  %vm695_vm15 = vweird.f32 %v1097_v4 }
0x1102   :  { %vm696_vm1 = vmor %vm694_vm0, %vm695_vm15 }
0x1103   :  { %v691_v6 = vsub.f32 1.0, %v690_v5 }
0x1105   :  { %v692_v7 = vmul.f32 %v1097_v4, %v691_v6 }
0x1107   :  { %v693_v8 = vadd.f32 %v1097_v4, %v692_v7 }
0x1109   :  { %v697_v11 = vsel %vm696_vm1, %v1097_v4, %v693_v8 }
0x110a   :  { %v702_v14 = vsel %vm699_vm2, %v701_v12, %v697_v11 }
0x110b   :  { %v705_v57 = vmul.f32 %v702_v14, %v1314_v34 }
0x1168   :  { %v708_v13 = vpop.permute.xlu0 %707 }
0x1169   :  { %v710_v15 = vmul.f32 %v708_v13, %v702_v14 }
0x116b   :  { %712 = vrot.lane.b32.xlu2 %v710_v15, %s1164_s9 }
0x1170   :  { %v751_v55 = vpop.permute.xlu0 %750 }
0x1171   :  { %v753_v17 = vadd.f32 %v751_v55, %v743_v16 }
0x1173   :  { %1098 = vtanh.f32 %v753_v17 }
0x1179   :  { %v1099_v18 = vpop.eup %1098 }
0x117a   :  { %756 = vrot.lane.b32.xlu2 %v1099_v18, %s1163_s8 }
0x11c5   :  { %v713_v20 = vpop.permute.xlu2 %712 }
0x11c6   :  { %v715_v21 = vadd.f32 %v713_v20, %v705_v57 }
0x11c8   :  { %1100 = vtanh.f32 %v715_v21 }
0x11ce   :  { %v1101_v22 = vpop.eup %1100 }
0x11cf   :  { %718 = vrot.lane.b32.xlu1 %v1101_v22, %s1163_s8 }
0x11d4   :  { %v757_v23 = vpop.permute.xlu2 %756 }
0x11d5   :  { %v759_v24 = vmul.f32 %v757_v23, %v740_v61 }
0x11d7   :  { %v768_v25 = vpack.c.bf16 %v759_v24, %v759_v24 }
0x11d9   :  { %770 = vrot.lane.b32.xlu0 %v768_v25, %s1164_s9 }
0x1241   :  { %v719_v31 = vpop.permute.xlu1 %718 }
0x1242   :  { %v721_v32 = vmul.f32 %v719_v31, %v702_v14 }
0x1244   :  { %v722_v33 = vpack.c.bf16 %v721_v32, %v721_v32 }
0x1246   :  { %801 = vrot.lane.b32.xlu1 %v722_v33, %s1164_s9 }
0x124b   :  { %v771_v34 = vpop.permute.xlu0 %770 }
0x124c   :  { %985 = vmatmul.msk.bf16.vlgmr.msra.gmra.mxu2 %vm261_vm7, %v771_v34 }
0x12b8   :  { %v802_v35 = vpop.permute.xlu1 %801 }
0x12b9   :  { %994 = vmatmul.msk.bf16.vlgmr.msra.gmra.mxu3 %vm261_vm7, %v802_v35 }
0x12cf   :  { %v796_v36 = vpop.f32.mrf.mxu2 }
0x12d7   :  { %v798_v37 = vpop.f32.mrf.mxu2 }
0x133c   :  { %v827_v39 = vpop.f32.mrf.mxu3 }
0x133d   :  { %v828_v40 = vadd.f32 %v827_v39, %v796_v36 }
0x133f   :  { %v835_v41 = vadd.f32 %v1029_v38, %v828_v40 }
0x1341   :  { %v995_v42 = vmul.f32 -1.442695, %v835_v41 }
0x1343   :  { %1102 = vpow2.f32 %v995_v42 }
0x1344   :  { %v829_v43 = vpop.f32.mrf.mxu3 }
0x1349   :  { %v1103_v60 = vpop.eup %1102 }
0x134a   :  { %v839_v44 = vadd.f32 1.0, %v1103_v60 }
0x134c   :  { %1104 = vrcp.f32 %v839_v44  ;;  %v851_v26 = vand.u32 2147483648, %v839_v44  ;;  %v849_v48 = vand.u32 2147483647, %v839_v44  ;;  %vm845_vm3 = vweird.f32 %v839_v44 }
0x134e   :  { %v852_v50 = vor.u32 1.1754944e-38, %v851_v26  ;;  %vm850_vm5 = vcmp.eq.f32.partialorder %v849_v48, 8.507059e+37 }
0x1352   :  { %v1105_v45 = vpop.eup %1104 }
0x1353   :  { %v841_v19 = vmul.f32 %v1105_v45, %v839_v44  ;;  %vm846_vm7 = vweird.f32 %v1105_v45 }
0x1354   :  { %vm847_vm4 = vmor %vm845_vm3, %vm846_vm7 }
0x1355   :  { %v842_v46 = vsub.f32 1.0, %v841_v19 }
0x1357   :  { %v843_v47 = vmul.f32 %v1105_v45, %v842_v46 }
0x1359   :  { %v844_v49 = vadd.f32 %v1105_v45, %v843_v47 }
0x135b   :  { %v848_v51 = vsel %vm847_vm4, %v1105_v45, %v844_v49 }
0x135c   :  { %v853_v52 = vsel %vm850_vm5, %v852_v50, %v848_v51 }
0x135d   :  { %855 = vst [vmem:[#allocation5] sm:$0xff] %v853_v52 }
0x135e   :  { %866 = dma.vmem_to_hbm [thread:$0]  %s862_s30, 128, %s864_s2, [#allocation4]  }
0x135f   :  { %1156 = dma.done.wait [#allocation4], 128  }
0x1360   :  { %1157 = vsyncadd [#allocation4], 4294967168 }
0x1361   :  { %871 = vsyncpa [#allocation3], 1 }
0x1362   :  { %872 = vsyncpa [#allocation4], 1 }

</bundles_post_ra>
